<compile_context>
chip_gen: v7x
topology: tpu7x:2x2x1
jax: 0.10.0
libtpu: 0.0.40
codegen_flags: <defaults>
</compile_context>

<pallas_src>
import functools

import jax
import jax.numpy as jnp
from jax.experimental import pallas as pl
from jax.experimental.pallas import tpu as pltpu

SMOOTH = 1e-05

_LANE = 128
_SUB = 8


def _cdiv(a, b):
    return -(-a // b)


def _round_up(x, m):
    return _cdiv(x, m) * m


def _vmem_capacity_bytes():
    try:
        return int(pltpu.get_tpu_info().vmem_capacity_bytes)
    except Exception:
        return 64 * 1024 * 1024  # conservative: v7x per-TensorCore VMEM


def _dice_partials_kernel(yp_ref, lb_ref, out_ref, *, num_classes, valid_rows,
                          s_tile, tiles_per_split, need_mask):
    """Accumulate per-class (intersection, union) lane/sublane partial sums.

    yp_ref : (C, S_TILE, 128)      predictions, native dtype
    lb_ref : (S_TILE, 128)         class labels, native dtype
    out_ref: (2*C, 8, 128) float32 rows [0, C) = intersection partials,
                                   rows [C, 2C) = union partials.
    The innermost grid axis walks spatial tiles; out_ref's block index is
    constant along it, so it acts as the VMEM-resident accumulator.
    """
    p = pl.program_id(1)
    hw = pl.program_id(2)

    @pl.when(hw == 0)
    def _init():
        out_ref[...] = jnp.zeros_like(out_ref)

    # Per-tile label convert (float -> int truncation matches torch `.long()`
    # for the non-negative class indices this loss expects).
    lb = lb_ref[...]
    if lb.dtype != jnp.int32:
        lb = lb.astype(jnp.int32)

    valid = None
    if need_mask:
        # HW is static: mask rows past the real spatial extent (ragged last
        # tile and/or padding tiles introduced by the 2-way core split).
        tile_idx = p * tiles_per_split + hw
        row = tile_idx * s_tile + jax.lax.broadcasted_iota(
            jnp.int32, (s_tile, _LANE), 0)
        valid = row < valid_rows
        lb = jnp.where(valid, lb, -1)  # padding label matches no class

    grouped = (s_tile % _SUB == 0)

    for c in range(num_classes):  # C is small; static unrolled loop
        ypf = yp_ref[c].astype(jnp.float32)            # (S_TILE, 128)
        if need_mask:
            ypf = jnp.where(valid, ypf, 0.0)
        m = lb == c
        inter_t = jnp.where(m, ypf, 0.0)               # onehot * y_pred
        union_t = jnp.where(m, ypf + 1.0, ypf)         # onehot + y_pred (count folded in)
        if grouped:
            # Pure VPU vreg adds: (S_TILE,128) -> (S_TILE/8, 8, 128) -> (8,128)
            out_ref[c] += inter_t.reshape(s_tile // _SUB, _SUB, _LANE).sum(axis=0)
            out_ref[num_classes + c] += union_t.reshape(
                s_tile // _SUB, _SUB, _LANE).sum(axis=0)
        else:
            # Tiny spatial extent (single non-8-multiple tile): sub-vreg store
            # is fine here, the whole problem is small anyway.
            out_ref[c, 0:1, :] += inter_t.sum(axis=0, keepdims=True)
            out_ref[num_classes + c, 0:1, :] += union_t.sum(axis=0, keepdims=True)


def multiclass_dice_loss(y_pred, y_true, smooth=SMOOTH):
    """Matches MultiClassDiceLoss.forward.

    y_pred: (N, C, H, W) predictions (any float dtype; bf16 streams half bytes)
    y_true: (N, 1, H, W) integer class labels (any int/float dtype)
    returns scalar float32 loss = 1 - mean(dice)
    """
    N, C, H, W = y_pred.shape
    HW = H * W
    S = _cdiv(HW, _LANE)  # rows of 128 lanes

    if HW % _LANE == 0:
        # Free reshapes (contiguous): spatial axis -> (S rows) x (128 lanes).
        yp = y_pred.reshape(N, C, S, _LANE)
        lb = y_true.reshape(N, 1, S, _LANE)
    else:
        # TODO(synk): ragged HW takes one padding copy; in-kernel lane masking
        # of the tail would avoid it but complicates every tile's mask.
        pad = S * _LANE - HW
        yp = jnp.pad(y_pred.reshape(N, C, HW),
                     ((0, 0), (0, 0), (0, pad))).reshape(N, C, S, _LANE)
        lb = jnp.pad(y_true.reshape(N, 1, HW), ((0, 0), (0, 0), (0, pad)),
                     constant_values=-1).reshape(N, 1, S, _LANE)

    yp_itemsize = jnp.dtype(y_pred.dtype).itemsize
    lb_itemsize = jnp.dtype(y_true.dtype).itemsize

    # Generation-aware tile sizing: ~16 MiB y_pred tiles on 128-MiB VMEM parts
    # (v5e/v6e), ~8 MiB on 64-MiB v7x; large enough to amortize the ~0.35 us
    # per-grid-step overhead, small enough for double buffering.
    vmem_cap = _vmem_capacity_bytes()
    target_tile_bytes = min(16 * 1024 * 1024, max(2 * 1024 * 1024, vmem_cap // 8))
    s_tile_max = max(_SUB,
                     (target_tile_bytes // (C * _LANE * yp_itemsize)) // _SUB * _SUB)

    if S <= s_tile_max:
        s_tile = S               # single tile: block equals full spatial dim
        tiles = 1
    else:
        tiles = _cdiv(S, s_tile_max)
        s_tile = _round_up(_cdiv(S, tiles), _SUB)   # balanced, multiple of 8
        tiles = _cdiv(S, s_tile)

    # v7x has 2 TensorCores: if the (parallel) batch axis can't feed both,
    # split the spatial tiles into an outer parallel factor instead.
    p_split = 2 if (N == 1 and tiles >= 2) else 1
    tiles_per_split = _cdiv(tiles, p_split)
    need_mask = (p_split * tiles_per_split * s_tile) != S
    clamp_needed = (p_split * tiles_per_split) != tiles

    def _tile_index(p, hw):
        t = p * tiles_per_split + hw
        if clamp_needed:
            # Padding grid steps re-read the last real tile; the in-kernel row
            # mask (computed from the *logical* tile index) zeroes them out.
            t = jnp.minimum(t, tiles - 1)
        return t

    kernel = functools.partial(
        _dice_partials_kernel, num_classes=C, valid_rows=S, s_tile=s_tile,
        tiles_per_split=tiles_per_split, need_mask=need_mask)

    grid_spec = pltpu.PrefetchScalarGridSpec(
        num_scalar_prefetch=0,
        grid=(N, p_split, tiles_per_split),
        in_specs=[
            pl.BlockSpec((None, C, s_tile, _LANE),
                         lambda n, p, hw: (n, 0, _tile_index(p, hw), 0)),
            pl.BlockSpec((None, None, s_tile, _LANE),
                         lambda n, p, hw: (n, 0, _tile_index(p, hw), 0)),
        ],
        out_specs=pl.BlockSpec((None, None, 2 * C, _SUB, _LANE),
                               lambda n, p, hw: (n, p, 0, 0, 0)),
    )

    yp_tile_bytes = C * s_tile * _LANE * yp_itemsize
    lb_tile_bytes = s_tile * _LANE * lb_itemsize
    out_tile_bytes = 2 * C * _SUB * _LANE * 4
    vmem_limit = min(vmem_cap,
                     max(32 * 1024 * 1024,
                         2 * (yp_tile_bytes + lb_tile_bytes)
                         + out_tile_bytes + 8 * 1024 * 1024))

    cost = pl.CostEstimate(
        flops=6 * N * C * S * _LANE,
        transcendentals=0,
        bytes_accessed=(N * C * S * _LANE * yp_itemsize
                        + N * S * _LANE * lb_itemsize
                        + N * p_split * out_tile_bytes),
    )

    partials = pl.pallas_call(
        kernel,
        out_shape=jax.ShapeDtypeStruct((N, p_split, 2 * C, _SUB, _LANE),
                                       jnp.float32),
        grid_spec=grid_spec,
        compiler_params=pltpu.CompilerParams(
            dimension_semantics=("parallel", "parallel", "arbitrary"),
            vmem_limit_bytes=int(vmem_limit),
        ),
        cost_estimate=cost,
    )(yp, lb)

    # Tiny epilogue: fold the core split + deferred lane/sublane reduction,
    # then the dice ratio and mean.
    totals = partials.sum(axis=(1, 3, 4))          # (N, 2*C)
    inter = totals[:, :C]
    union = totals[:, C:]
    dice = (2.0 * inter + smooth) / (union + smooth)
    return 1.0 - jnp.mean(dice)


def _reference_loss(y_pred, y_true, smooth=SMOOTH):
    # Pure-JAX reference mirroring the PyTorch module.
    N, C, H, W = y_pred.shape
    labels = y_true.reshape(N, H, W).astype(jnp.int32)
    onehot = jax.nn.one_hot(labels, C, dtype=jnp.float32)        # (N, H, W, C)
    onehot = jnp.transpose(onehot, (0, 3, 1, 2))                 # (N, C, H, W)
    inter = jnp.sum(onehot * y_pred.astype(jnp.float32), axis=(2, 3))
    union = jnp.sum(onehot + y_pred.astype(jnp.float32), axis=(2, 3))
    dice = (2.0 * inter + smooth) / (union + smooth)
    return 1.0 - jnp.mean(dice)


if __name__ == "__main__":
    key = jax.random.PRNGKey(0)
    k1, k2 = jax.random.split(key)

    N, C, H, W = 2, 4, 16, 16
    # Predictions: softmax over the channel dim (typical usage for dice loss).
    logits = jax.random.normal(k1, (N, C, H, W), dtype=jnp.float32)
    y_pred = jax.nn.softmax(logits, axis=1)
    # Integer labels stored as float (the PyTorch code casts with .long()).
    y_true = jax.random.randint(k2, (N, 1, H, W), 0, C).astype(jnp.float32)

    loss = multiclass_dice_loss(y_pred, y_true)
    loss = jax.block_until_ready(loss)

    ref = jax.block_until_ready(_reference_loss(y_pred, y_true))
    assert jnp.allclose(loss, ref, rtol=1e-5, atol=1e-6), (loss, ref)

    print("KERNEL_OK")
</pallas_src>

<mosaic_0001>
module attributes {stable_mosaic.version = 11 : i64} {
  func.func @_dice_partials_kernel(%arg0: i32, %arg1: i32, %arg2: i32, %arg3: memref<1x4x2x128xf32, #tpu.memory_space<vmem>>, %arg4: memref<1x1x2x128xf32, #tpu.memory_space<vmem>>, %arg5: memref<1x1x8x8x128xf32, #tpu.memory_space<vmem>>) attributes {dimension_semantics = [#tpu.dimension_semantics<parallel>, #tpu.dimension_semantics<parallel>, #tpu.dimension_semantics<arbitrary>], iteration_bounds = array<i64: 2, 1, 1>, scalar_prefetch = 0 : i64, scratch_operands = 0 : i64, tpu.core_type = #tpu.core_type<tc>, window_params = [{transform_indices = @transform_0, window_bounds = array<i64: 1, 4, 2, 128>}, {transform_indices = @transform_1, window_bounds = array<i64: 1, 1, 2, 128>}, {transform_indices = @transform_2, window_bounds = array<i64: 1, 1, 8, 8, 128>}]} {
    %c0_i32 = arith.constant 0 : i32
    %0 = arith.cmpi eq, %arg2, %c0_i32 : i32
    %1 = arith.extui %0 : i1 to i32
    %c0_i32_0 = arith.constant 0 : i32
    %2 = arith.cmpi ne, %1, %c0_i32_0 : i32
    scf.if %2 {
      %cst_109 = arith.constant 0.000000e+00 : f32
      %106 = vector.broadcast %cst_109 : f32 to vector<8x8x128xf32>
      %c0_110 = arith.constant 0 : index
      %c0_111 = arith.constant 0 : index
      %c0_112 = arith.constant 0 : index
      %c0_113 = arith.constant 0 : index
      %c0_114 = arith.constant 0 : index
      %107 = vector.load %arg5[%c0_110, %c0_111, %c0_112, %c0_113, %c0_114] : memref<1x1x8x8x128xf32, #tpu.memory_space<vmem>>, vector<1x1x8x8x128xf32>
      %108 = vector.shape_cast %107 : vector<1x1x8x8x128xf32> to vector<8x8x128xf32>
      %109 = vector.shape_cast %106 : vector<8x8x128xf32> to vector<1x1x8x8x128xf32>
      tpu.vector_store %arg5[%c0_110, %c0_111, %c0_112, %c0_113, %c0_114], %109 {strides = array<i32>} : memref<1x1x8x8x128xf32, #tpu.memory_space<vmem>>, vector<1x1x8x8x128xf32>,
    } else {
    }
    %c0 = arith.constant 0 : index
    %c0_1 = arith.constant 0 : index
    %c0_2 = arith.constant 0 : index
    %c0_3 = arith.constant 0 : index
    %3 = vector.load %arg4[%c0, %c0_1, %c0_2, %c0_3] : memref<1x1x2x128xf32, #tpu.memory_space<vmem>>, vector<1x1x2x128xf32>
    %4 = vector.shape_cast %3 : vector<1x1x2x128xf32> to vector<2x128xf32>
    %5 = arith.fptosi %4 : vector<2x128xf32> to vector<2x128xi32>
    %c0_4 = arith.constant 0 : index
    %c0_5 = arith.constant 0 : index
    %c0_6 = arith.constant 0 : index
    %c0_7 = arith.constant 0 : index
    %6 = vector.load %arg3[%c0_4, %c0_5, %c0_6, %c0_7] : memref<1x4x2x128xf32, #tpu.memory_space<vmem>>, vector<1x1x2x128xf32>
    %7 = vector.shape_cast %6 : vector<1x1x2x128xf32> to vector<2x128xf32>
    %c0_i32_8 = arith.constant 0 : i32
    %8 = vector.broadcast %c0_i32_8 : i32 to vector<2x128xi32>
    %9 = arith.cmpi eq, %5, %8 : vector<2x128xi32>
    %cst = arith.constant 0.000000e+00 : f32
    %10 = vector.broadcast %cst : f32 to vector<2x128xf32>
    %11 = arith.select %9, %7, %10 : vector<2x128xi1>, vector<2x128xf32>
    %cst_9 = arith.constant 1.000000e+00 : f32
    %12 = vector.broadcast %cst_9 : f32 to vector<2x128xf32>
    %13 = arith.addf %7, %12 : vector<2x128xf32>
    %14 = arith.select %9, %13, %7 : vector<2x128xi1>, vector<2x128xf32>
    %c0_10 = arith.constant 0 : index
    %c0_11 = arith.constant 0 : index
    %c0_12 = arith.constant 0 : index
    %c0_13 = arith.constant 0 : index
    %c0_14 = arith.constant 0 : index
    %15 = vector.load %arg5[%c0_10, %c0_11, %c0_12, %c0_13, %c0_14] : memref<1x1x8x8x128xf32, #tpu.memory_space<vmem>>, vector<1x1x1x1x128xf32>
    %16 = vector.shape_cast %15 : vector<1x1x1x1x128xf32> to vector<1x128xf32>
    %cst_15 = arith.constant dense<0.000000e+00> : vector<128xf32>
    %17 = vector.multi_reduction <add>, %11, %cst_15 [0] : vector<2x128xf32> to vector<128xf32>
    %18 = vector.shape_cast %17 : vector<128xf32> to vector<1x128xf32>
    %19 = arith.addf %16, %18 : vector<1x128xf32>
    %c0_16 = arith.constant 0 : index
    %c0_17 = arith.constant 0 : index
    %c0_18 = arith.constant 0 : index
    %c0_19 = arith.constant 0 : index
    %c0_20 = arith.constant 0 : index
    %20 = vector.load %arg5[%c0_16, %c0_17, %c0_18, %c0_19, %c0_20] : memref<1x1x8x8x128xf32, #tpu.memory_space<vmem>>, vector<1x1x1x1x128xf32>
    %21 = vector.shape_cast %20 : vector<1x1x1x1x128xf32> to vector<1x128xf32>
    %22 = vector.shape_cast %19 : vector<1x128xf32> to vector<1x1x1x1x128xf32>
    tpu.vector_store %arg5[%c0_16, %c0_17, %c0_18, %c0_19, %c0_20], %22 {strides = array<i32>} : memref<1x1x8x8x128xf32, #tpu.memory_space<vmem>>, vector<1x1x1x1x128xf32>,
    %c0_21 = arith.constant 0 : index
    %c0_22 = arith.constant 0 : index
    %c4 = arith.constant 4 : index
    %c0_23 = arith.constant 0 : index
    %c0_24 = arith.constant 0 : index
    %23 = vector.load %arg5[%c0_21, %c0_22, %c4, %c0_23, %c0_24] : memref<1x1x8x8x128xf32, #tpu.memory_space<vmem>>, vector<1x1x1x1x128xf32>
    %24 = vector.shape_cast %23 : vector<1x1x1x1x128xf32> to vector<1x128xf32>
    %cst_25 = arith.constant dense<0.000000e+00> : vector<128xf32>
    %25 = vector.multi_reduction <add>, %14, %cst_25 [0] : vector<2x128xf32> to vector<128xf32>
    %26 = vector.shape_cast %25 : vector<128xf32> to vector<1x128xf32>
    %27 = arith.addf %24, %26 : vector<1x128xf32>
    %c0_26 = arith.constant 0 : index
    %c0_27 = arith.constant 0 : index
    %c4_28 = arith.constant 4 : index
    %c0_29 = arith.constant 0 : index
    %c0_30 = arith.constant 0 : index
    %28 = vector.load %arg5[%c0_26, %c0_27, %c4_28, %c0_29, %c0_30] : memref<1x1x8x8x128xf32, #tpu.memory_space<vmem>>, vector<1x1x1x1x128xf32>
    %29 = vector.shape_cast %28 : vector<1x1x1x1x128xf32> to vector<1x128xf32>
    %30 = vector.shape_cast %27 : vector<1x128xf32> to vector<1x1x1x1x128xf32>
    tpu.vector_store %arg5[%c0_26, %c0_27, %c4_28, %c0_29, %c0_30], %30 {strides = array<i32>} : memref<1x1x8x8x128xf32, #tpu.memory_space<vmem>>, vector<1x1x1x1x128xf32>,
    %c0_31 = arith.constant 0 : index
    %c1 = arith.constant 1 : index
    %c0_32 = arith.constant 0 : index
    %c0_33 = arith.constant 0 : index
    %31 = vector.load %arg3[%c0_31, %c1, %c0_32, %c0_33] : memref<1x4x2x128xf32, #tpu.memory_space<vmem>>, vector<1x1x2x128xf32>
    %32 = vector.shape_cast %31 : vector<1x1x2x128xf32> to vector<2x128xf32>
    %c1_i32 = arith.constant 1 : i32
    %33 = vector.broadcast %c1_i32 : i32 to vector<2x128xi32>
    %34 = arith.cmpi eq, %5, %33 : vector<2x128xi32>
    %cst_34 = arith.constant 0.000000e+00 : f32
    %35 = vector.broadcast %cst_34 : f32 to vector<2x128xf32>
    %36 = arith.select %34, %32, %35 : vector<2x128xi1>, vector<2x128xf32>
    %cst_35 = arith.constant 1.000000e+00 : f32
    %37 = vector.broadcast %cst_35 : f32 to vector<2x128xf32>
    %38 = arith.addf %32, %37 : vector<2x128xf32>
    %39 = arith.select %34, %38, %32 : vector<2x128xi1>, vector<2x128xf32>
    %c0_36 = arith.constant 0 : index
    %c0_37 = arith.constant 0 : index
    %c1_38 = arith.constant 1 : index
    %c0_39 = arith.constant 0 : index
    %c0_40 = arith.constant 0 : index
    %40 = vector.load %arg5[%c0_36, %c0_37, %c1_38, %c0_39, %c0_40] : memref<1x1x8x8x128xf32, #tpu.memory_space<vmem>>, vector<1x1x1x1x128xf32>
    %41 = vector.shape_cast %40 : vector<1x1x1x1x128xf32> to vector<1x128xf32>
    %cst_41 = arith.constant dense<0.000000e+00> : vector<128xf32>
    %42 = vector.multi_reduction <add>, %36, %cst_41 [0] : vector<2x128xf32> to vector<128xf32>
    %43 = vector.shape_cast %42 : vector<128xf32> to vector<1x128xf32>
    %44 = arith.addf %41, %43 : vector<1x128xf32>
    %c0_42 = arith.constant 0 : index
    %c0_43 = arith.constant 0 : index
    %c1_44 = arith.constant 1 : index
    %c0_45 = arith.constant 0 : index
    %c0_46 = arith.constant 0 : index
    %45 = vector.load %arg5[%c0_42, %c0_43, %c1_44, %c0_45, %c0_46] : memref<1x1x8x8x128xf32, #tpu.memory_space<vmem>>, vector<1x1x1x1x128xf32>
    %46 = vector.shape_cast %45 : vector<1x1x1x1x128xf32> to vector<1x128xf32>
    %47 = vector.shape_cast %44 : vector<1x128xf32> to vector<1x1x1x1x128xf32>
    tpu.vector_store %arg5[%c0_42, %c0_43, %c1_44, %c0_45, %c0_46], %47 {strides = array<i32>} : memref<1x1x8x8x128xf32, #tpu.memory_space<vmem>>, vector<1x1x1x1x128xf32>,
    %c0_47 = arith.constant 0 : index
    %c0_48 = arith.constant 0 : index
    %c5 = arith.constant 5 : index
    %c0_49 = arith.constant 0 : index
    %c0_50 = arith.constant 0 : index
    %48 = vector.load %arg5[%c0_47, %c0_48, %c5, %c0_49, %c0_50] : memref<1x1x8x8x128xf32, #tpu.memory_space<vmem>>, vector<1x1x1x1x128xf32>
    %49 = vector.shape_cast %48 : vector<1x1x1x1x128xf32> to vector<1x128xf32>
    %cst_51 = arith.constant dense<0.000000e+00> : vector<128xf32>
    %50 = vector.multi_reduction <add>, %39, %cst_51 [0] : vector<2x128xf32> to vector<128xf32>
    %51 = vector.shape_cast %50 : vector<128xf32> to vector<1x128xf32>
    %52 = arith.addf %49, %51 : vector<1x128xf32>
    %c0_52 = arith.constant 0 : index
    %c0_53 = arith.constant 0 : index
    %c5_54 = arith.constant 5 : index
    %c0_55 = arith.constant 0 : index
    %c0_56 = arith.constant 0 : index
    %53 = vector.load %arg5[%c0_52, %c0_53, %c5_54, %c0_55, %c0_56] : memref<1x1x8x8x128xf32, #tpu.memory_space<vmem>>, vector<1x1x1x1x128xf32>
    %54 = vector.shape_cast %53 : vector<1x1x1x1x128xf32> to vector<1x128xf32>
    %55 = vector.shape_cast %52 : vector<1x128xf32> to vector<1x1x1x1x128xf32>
    tpu.vector_store %arg5[%c0_52, %c0_53, %c5_54, %c0_55, %c0_56], %55 {strides = array<i32>} : memref<1x1x8x8x128xf32, #tpu.memory_space<vmem>>, vector<1x1x1x1x128xf32>,
    %c0_57 = arith.constant 0 : index
    %c2 = arith.constant 2 : index
    %c0_58 = arith.constant 0 : index
    %c0_59 = arith.constant 0 : index
    %56 = vector.load %arg3[%c0_57, %c2, %c0_58, %c0_59] : memref<1x4x2x128xf32, #tpu.memory_space<vmem>>, vector<1x1x2x128xf32>
    %57 = vector.shape_cast %56 : vector<1x1x2x128xf32> to vector<2x128xf32>
    %c2_i32 = arith.constant 2 : i32
    %58 = vector.broadcast %c2_i32 : i32 to vector<2x128xi32>
    %59 = arith.cmpi eq, %5, %58 : vector<2x128xi32>
    %cst_60 = arith.constant 0.000000e+00 : f32
    %60 = vector.broadcast %cst_60 : f32 to vector<2x128xf32>
    %61 = arith.select %59, %57, %60 : vector<2x128xi1>, vector<2x128xf32>
    %cst_61 = arith.constant 1.000000e+00 : f32
    %62 = vector.broadcast %cst_61 : f32 to vector<2x128xf32>
    %63 = arith.addf %57, %62 : vector<2x128xf32>
    %64 = arith.select %59, %63, %57 : vector<2x128xi1>, vector<2x128xf32>
    %c0_62 = arith.constant 0 : index
    %c0_63 = arith.constant 0 : index
    %c2_64 = arith.constant 2 : index
    %c0_65 = arith.constant 0 : index
    %c0_66 = arith.constant 0 : index
    %65 = vector.load %arg5[%c0_62, %c0_63, %c2_64, %c0_65, %c0_66] : memref<1x1x8x8x128xf32, #tpu.memory_space<vmem>>, vector<1x1x1x1x128xf32>
    %66 = vector.shape_cast %65 : vector<1x1x1x1x128xf32> to vector<1x128xf32>
    %cst_67 = arith.constant dense<0.000000e+00> : vector<128xf32>
    %67 = vector.multi_reduction <add>, %61, %cst_67 [0] : vector<2x128xf32> to vector<128xf32>
    %68 = vector.shape_cast %67 : vector<128xf32> to vector<1x128xf32>
    %69 = arith.addf %66, %68 : vector<1x128xf32>
    %c0_68 = arith.constant 0 : index
    %c0_69 = arith.constant 0 : index
    %c2_70 = arith.constant 2 : index
    %c0_71 = arith.constant 0 : index
    %c0_72 = arith.constant 0 : index
    %70 = vector.load %arg5[%c0_68, %c0_69, %c2_70, %c0_71, %c0_72] : memref<1x1x8x8x128xf32, #tpu.memory_space<vmem>>, vector<1x1x1x1x128xf32>
    %71 = vector.shape_cast %70 : vector<1x1x1x1x128xf32> to vector<1x128xf32>
    %72 = vector.shape_cast %69 : vector<1x128xf32> to vector<1x1x1x1x128xf32>
    tpu.vector_store %arg5[%c0_68, %c0_69, %c2_70, %c0_71, %c0_72], %72 {strides = array<i32>} : memref<1x1x8x8x128xf32, #tpu.memory_space<vmem>>, vector<1x1x1x1x128xf32>,
    %c0_73 = arith.constant 0 : index
    %c0_74 = arith.constant 0 : index
    %c6 = arith.constant 6 : index
    %c0_75 = arith.constant 0 : index
    %c0_76 = arith.constant 0 : index
    %73 = vector.load %arg5[%c0_73, %c0_74, %c6, %c0_75, %c0_76] : memref<1x1x8x8x128xf32, #tpu.memory_space<vmem>>, vector<1x1x1x1x128xf32>
    %74 = vector.shape_cast %73 : vector<1x1x1x1x128xf32> to vector<1x128xf32>
    %cst_77 = arith.constant dense<0.000000e+00> : vector<128xf32>
    %75 = vector.multi_reduction <add>, %64, %cst_77 [0] : vector<2x128xf32> to vector<128xf32>
    %76 = vector.shape_cast %75 : vector<128xf32> to vector<1x128xf32>
    %77 = arith.addf %74, %76 : vector<1x128xf32>
    %c0_78 = arith.constant 0 : index
    %c0_79 = arith.constant 0 : index
    %c6_80 = arith.constant 6 : index
    %c0_81 = arith.constant 0 : index
    %c0_82 = arith.constant 0 : index
    %78 = vector.load %arg5[%c0_78, %c0_79, %c6_80, %c0_81, %c0_82] : memref<1x1x8x8x128xf32, #tpu.memory_space<vmem>>, vector<1x1x1x1x128xf32>
    %79 = vector.shape_cast %78 : vector<1x1x1x1x128xf32> to vector<1x128xf32>
    %80 = vector.shape_cast %77 : vector<1x128xf32> to vector<1x1x1x1x128xf32>
    tpu.vector_store %arg5[%c0_78, %c0_79, %c6_80, %c0_81, %c0_82], %80 {strides = array<i32>} : memref<1x1x8x8x128xf32, #tpu.memory_space<vmem>>, vector<1x1x1x1x128xf32>,
    %c0_83 = arith.constant 0 : index
    %c3 = arith.constant 3 : index
    %c0_84 = arith.constant 0 : index
    %c0_85 = arith.constant 0 : index
    %81 = vector.load %arg3[%c0_83, %c3, %c0_84, %c0_85] : memref<1x4x2x128xf32, #tpu.memory_space<vmem>>, vector<1x1x2x128xf32>
    %82 = vector.shape_cast %81 : vector<1x1x2x128xf32> to vector<2x128xf32>
    %c3_i32 = arith.constant 3 : i32
    %83 = vector.broadcast %c3_i32 : i32 to vector<2x128xi32>
    %84 = arith.cmpi eq, %5, %83 : vector<2x128xi32>
    %cst_86 = arith.constant 0.000000e+00 : f32
    %85 = vector.broadcast %cst_86 : f32 to vector<2x128xf32>
    %86 = arith.select %84, %82, %85 : vector<2x128xi1>, vector<2x128xf32>
    %cst_87 = arith.constant 1.000000e+00 : f32
    %87 = vector.broadcast %cst_87 : f32 to vector<2x128xf32>
    %88 = arith.addf %82, %87 : vector<2x128xf32>
    %89 = arith.select %84, %88, %82 : vector<2x128xi1>, vector<2x128xf32>
    %c0_88 = arith.constant 0 : index
    %c0_89 = arith.constant 0 : index
    %c3_90 = arith.constant 3 : index
    %c0_91 = arith.constant 0 : index
    %c0_92 = arith.constant 0 : index
    %90 = vector.load %arg5[%c0_88, %c0_89, %c3_90, %c0_91, %c0_92] : memref<1x1x8x8x128xf32, #tpu.memory_space<vmem>>, vector<1x1x1x1x128xf32>
    %91 = vector.shape_cast %90 : vector<1x1x1x1x128xf32> to vector<1x128xf32>
    %cst_93 = arith.constant dense<0.000000e+00> : vector<128xf32>
    %92 = vector.multi_reduction <add>, %86, %cst_93 [0] : vector<2x128xf32> to vector<128xf32>
    %93 = vector.shape_cast %92 : vector<128xf32> to vector<1x128xf32>
    %94 = arith.addf %91, %93 : vector<1x128xf32>
    %c0_94 = arith.constant 0 : index
    %c0_95 = arith.constant 0 : index
    %c3_96 = arith.constant 3 : index
    %c0_97 = arith.constant 0 : index
    %c0_98 = arith.constant 0 : index
    %95 = vector.load %arg5[%c0_94, %c0_95, %c3_96, %c0_97, %c0_98] : memref<1x1x8x8x128xf32, #tpu.memory_space<vmem>>, vector<1x1x1x1x128xf32>
    %96 = vector.shape_cast %95 : vector<1x1x1x1x128xf32> to vector<1x128xf32>
    %97 = vector.shape_cast %94 : vector<1x128xf32> to vector<1x1x1x1x128xf32>
    tpu.vector_store %arg5[%c0_94, %c0_95, %c3_96, %c0_97, %c0_98], %97 {strides = array<i32>} : memref<1x1x8x8x128xf32, #tpu.memory_space<vmem>>, vector<1x1x1x1x128xf32>,
    %c0_99 = arith.constant 0 : index
    %c0_100 = arith.constant 0 : index
    %c7 = arith.constant 7 : index
    %c0_101 = arith.constant 0 : index
    %c0_102 = arith.constant 0 : index
    %98 = vector.load %arg5[%c0_99, %c0_100, %c7, %c0_101, %c0_102] : memref<1x1x8x8x128xf32, #tpu.memory_space<vmem>>, vector<1x1x1x1x128xf32>
    %99 = vector.shape_cast %98 : vector<1x1x1x1x128xf32> to vector<1x128xf32>
    %cst_103 = arith.constant dense<0.000000e+00> : vector<128xf32>
    %100 = vector.multi_reduction <add>, %89, %cst_103 [0] : vector<2x128xf32> to vector<128xf32>
    %101 = vector.shape_cast %100 : vector<128xf32> to vector<1x128xf32>
    %102 = arith.addf %99, %101 : vector<1x128xf32>
    %c0_104 = arith.constant 0 : index
    %c0_105 = arith.constant 0 : index
    %c7_106 = arith.constant 7 : index
    %c0_107 = arith.constant 0 : index
    %c0_108 = arith.constant 0 : index
    %103 = vector.load %arg5[%c0_104, %c0_105, %c7_106, %c0_107, %c0_108] : memref<1x1x8x8x128xf32, #tpu.memory_space<vmem>>, vector<1x1x1x1x128xf32>
    %104 = vector.shape_cast %103 : vector<1x1x1x1x128xf32> to vector<1x128xf32>
    %105 = vector.shape_cast %102 : vector<1x128xf32> to vector<1x1x1x1x128xf32>
    tpu.vector_store %arg5[%c0_104, %c0_105, %c7_106, %c0_107, %c0_108], %105 {strides = array<i32>} : memref<1x1x8x8x128xf32, #tpu.memory_space<vmem>>, vector<1x1x1x1x128xf32>,
    return
  }
  func.func @transform_0(%arg0: i32, %arg1: i32, %arg2: i32) -> (i32, i32, i32, i32) {
    %c1_i32 = arith.constant 1 : i32
    %0 = arith.muli %arg1, %c1_i32 : i32
    %1 = arith.addi %0, %arg2 : i32
    %c0_i32 = arith.constant 0 : i32
    %c0_i32_0 = arith.constant 0 : i32
    %c0_i32_1 = arith.constant 0 : i32
    return %arg0, %c0_i32, %1, %c0_i32_0 : i32, i32, i32, i32
  }
  func.func @transform_1(%arg0: i32, %arg1: i32, %arg2: i32) -> (i32, i32, i32, i32) {
    %c1_i32 = arith.constant 1 : i32
    %0 = arith.muli %arg1, %c1_i32 : i32
    %1 = arith.addi %0, %arg2 : i32
    %c0_i32 = arith.constant 0 : i32
    %c0_i32_0 = arith.constant 0 : i32
    %c0_i32_1 = arith.constant 0 : i32
    return %arg0, %c0_i32, %1, %c0_i32_0 : i32, i32, i32, i32
  }
  func.func @transform_2(%arg0: i32, %arg1: i32, %arg2: i32) -> (i32, i32, i32, i32, i32) {
    %c0_i32 = arith.constant 0 : i32
    %c0_i32_0 = arith.constant 0 : i32
    %c0_i32_1 = arith.constant 0 : i32
    %c0_i32_2 = arith.constant 0 : i32
    return %arg0, %arg1, %c0_i32, %c0_i32_0, %c0_i32_1 : i32, i32, i32, i32, i32
  }
}

</mosaic_0001>

<bundles_post_ra>
// kernel: tpu_custom_call.1
= control target key start
LH: loop header
LB: loop body
LE: loop exit
PB: predicated region body
PF: predicated region fallthrough
CT: control target
= control target key end

     0   :  { %7 = vsyncpa [#allocation3], 0  ;;  %s1027_s0 = inlined_call_operand.hbm [shape: f32[2,4,2,128], index: 0, kind: input, shape index: {}]   ;;  %s1028_s1 = inlined_call_operand.hbm [shape: f32[2,1,2,128], index: 1, kind: input, shape index: {}]   ;;  %s1029_s2 = inlined_call_operand.hbm [shape: f32[2,1,8,8,128], index: 2, kind: output, shape index: {}]  }
   0x1   :  { %9 = vsyncpa [#allocation3 + $0x1], 0 }
   0x2   :  { %10 = vsyncpa [#allocation6], 0 }
   0x3   :  { %12 = vsyncpa [#allocation6 + $0x1], 0 }
   0x4   :  { %13 = vsyncpa [#allocation4], 0 }
   0x5   :  { %15 = vsyncpa [#allocation4 + $0x1], 0  ;;  %s772_s9 = smov 0   ;;  %s774_s10 = smov 0  }
   0x6   :  { %s776_s11 = smov 0   ;;  %s778_s12 = smov 0  }
   0x7   :  { %s780_s13 = smov 0   ;;  %s782_s14 = smov 0  }
   0x8 LB: > { %s490_s15 = sadd.s32 4294967295, %s747_s14   ;;  %s491_s16 = sadd.s32 4294967294, %s747_s14   ;;  %s747_s14 = sphi %s782_s14, %s21_s14   ;;  %s743_s13 = sphi %s780_s13, %s1048_s13   ;;  %s739_s12 = sphi %s778_s12, %s1047_s12   ;;  %s735_s11 = sphi %s776_s11, %s1046_s11   ;;  %s731_s10 = sphi %s774_s10, %s1045_s10   ;;  %s727_s9 = sphi %s772_s9, %s1044_s9  }
   0x9   : > { %s40_s17 = sadd.s32 1, %s743_s13  ;;  %s51_s18 = sadd.s32 1, %s735_s11 }
   0xa   : > { %p42_p0 = scmp.ge.s32.totalorder %s40_s17, 2  ;;  %p58_p1 = scmp.ne.s32.totalorder %s735_s11, %s731_s10 }
   0xb   : > { %p59_p2 = scmp.eq.s32.totalorder %s747_s14, 0  ;;  %p64_p3 = scmp.ne.s32.totalorder %s731_s10, %s727_s9 }
   0xc   : > { %s1050_s17 = smov (%p42_p0, %s40_s17), 0  ;;  %p65_p5 = scmp.eq.s32.totalorder %s490_s15, 0 }
   0xd   : > { %p813_p4 = por %p59_p2, %p58_p1  ;;  %s46_s20 = ssub.s32 %s743_s13, %s1050_s17 }
   0xe   : > { %p120_p6 = scmp.eq.s32.totalorder %s490_s15, 1  ;;  %p49_p7 = scmp.eq.s32.totalorder %s46_s20, 0 }
   0xf   : > { %p819_p8 = por %p65_p5, %p64_p3  ;;  %p126_p10 = scmp.eq.s32.totalorder %s491_s16, 1 }
  0x10   : > { %p823_p9 = por %p120_p6, %p58_p1  ;;  %p546_p13 = scmp.lt.s32.totalorder %s747_s14, 2 }
  0x11   : > { %s1033_s21 = scalar_select %p819_p8, 1, 0 }
  0x12   : > { %s1034_s22 = scalar_select %p823_p9, 1, 0 }
  0x13   : > { %s828_s23 = scalar_select %p49_p7, %s735_s11, %s51_s18  }
  0x14   : > { %p830_p11 = por %p126_p10, %p64_p3  ;;  %s837_s25 = sand.u32 1, %s735_s11  }
  0x15   : > { %s494_s26 = sshll.u32 %s837_s25, 3  ;;  %s525_s27 = sshll.u32 %s743_s13, 7 }
  0x16   : > { %s1035_s24 = scalar_select %p830_p11, 1, 0 }
  0x17   : > { %s844_s30 = scalar_lea.hbm %s1027_s0, %s525_s27  ;;  %s150_s3 = scalar_lea.vmem [#allocation2], %s494_s26 }
  0x18   : > { %s159_s4 = sshll.u32 %s150_s3, 4  ;;  %p850_p0 = pnand %p546_p13, %p813_p4  ;;  %s846_s4 = int_to_ptr.vmem [resolvable:$true] %s159_s4 }
  0x19   : > { %s147_s6 = scalar_lea.sflag [#allocation3], %s837_s25  ;;  %s601_s7 = scalar_lea.hbm %s844_s30, 128 }
  0x1a   : > { %p602_p2 = scmp.ne.s32.totalorder %s844_s30, %s601_s7  ;;  %p603_p3 = pneg %p850_p0 }
  0x1b   : > { %s606_s16 = scalar_lea.hbm %s1027_s0, 256  ;;  %p607_p4 = scmp.lt.u32.totalorder %s844_s30, %s1027_s0 }
  0x1c   : > { %p604_p5 = pnand %p603_p3, %p602_p2  ;;  %p608_p7 = scmp.lt.u32.totalorder %s606_s16, %s601_s7 }
  0x1d   : > { %p610_p13 = scmp.lt.u32.totalorder %s601_s7, %s844_s30 }
  0x1e   : > { %p605_p6 = pneg %p604_p5  ;;  %p609_p10 = por %p608_p7, %p607_p4 }
  0x20   : > { %p611_p12 = por %p610_p13, %p609_p10 }
  0x22   : > { %p612_p1 = pnand %p611_p12, %p605_p6 }
  0x24   : > { %615 = shalt.err (!%p612_p1)
}
  0x25   : > { %s616_s20 = scalar_lea.vmem %s846_s4, 128  ;;  %s749_s26 = smov [#allocation2]  }
  0x26   : > { %p617_p2 = scmp.ne.s32.totalorder %s846_s4, %s616_s20  ;;  %s621_s27 = sshll.u32 %s749_s26, 4  ;;  %s622_s27 = int_to_ptr.vmem [resolvable:$false] %s621_s27 }
  0x27   : > { %s623_s28 = scalar_lea.vmem %s622_s27, 256  ;;  %p624_p9 = scmp.lt.s32.totalorder %s846_s4, %s622_s27 }
  0x28   : > { %p619_p5 = pnand %p617_p2, %p603_p3  ;;  %p625_p4 = scmp.lt.s32.totalorder %s623_s28, %s616_s20 }
  0x2a   : > { %p620_p11 = pneg %p619_p5  ;;  %p626_p7 = por %p625_p4, %p624_p9 }
  0x2c   : > { %p627_p10 = pnand %p626_p7, %p620_p11 }
  0x2e   : > { %630 = shalt.err (!%p627_p10)
}
  0x2f   : > { %s750_s29 = smov 32   ;;  %s751_s3 = smov 2  }
  0x30   : > { %538 = dma.hbm_to_vmem [thread:$0]  (!%p850_p0), %s844_s30, 128, %s846_s4, %s147_s6, %s750_s29, %s750_s29, %s751_s3  }
  0x31   : > { %p187_p12 = scmp.lt.s32.totalorder %s747_s14, 3  ;;  %s497_s7 = sshll.u32 %s837_s25, 1 }
  0x32   : > { %s498_s8 = sshll.u32 %s743_s13, 5  ;;  %p1037_p9 = scmp.ge.s32.totalorder %s747_s14, 1 }
  0x33   : > { %s895_s19 = scalar_lea.hbm %s1028_s1, %s498_s8  ;;  %s173_s20 = scalar_lea.vmem [#allocation5], %s497_s7 }
  0x34   : > { %p888_p11 = pnand %p1037_p9, %p187_p12  ;;  %s182_s26 = sshll.u32 %s173_s20, 4  ;;  %s183_s26 = int_to_ptr.vmem [resolvable:$true] %s182_s26 }
  0x35   : > { %s170_s30 = scalar_lea.sflag [#allocation6], %s837_s25  ;;  %s631_s4 = scalar_lea.hbm %s895_s19, 32 }
  0x36   : > { %s1038_s15 = scalar_select %p888_p11, 1, 0 }
  0x37   : > { %p632_p1 = scmp.ne.s32.totalorder %s895_s19, %s631_s4  ;;  %s636_s28 = scalar_lea.hbm %s1028_s1, 64 }
  0x38   : > { %p637_p2 = scmp.lt.u32.totalorder %s895_s19, %s1028_s1  ;;  %p638_p5 = scmp.lt.u32.totalorder %s636_s28, %s631_s4 }
  0x39   : > { %p634_p6 = pnand %p632_p1, %p603_p3  ;;  %p640_p7 = scmp.lt.u32.totalorder %s631_s4, %s895_s19 }
  0x3a   : > { %p639_p4 = por %p638_p5, %p637_p2 }
  0x3b   : > { %p635_p13 = pneg %p634_p6 }
  0x3c   : > { %p641_p10 = por %p640_p7, %p639_p4 }
  0x3e   : > { %p642_p12 = pnand %p641_p10, %p635_p13 }
  0x40   : > { %645 = shalt.err (!%p642_p12)
}
  0x41   : > { %s646_s25 = scalar_lea.vmem %s183_s26, 32  ;;  %s752_s7 = smov [#allocation5]  }
  0x42   : > { %p647_p9 = scmp.ne.s32.totalorder %s183_s26, %s646_s25  ;;  %s651_s8 = sshll.u32 %s752_s7, 4  ;;  %s652_s8 = int_to_ptr.vmem [resolvable:$false] %s651_s8 }
  0x43   : > { %s653_s16 = scalar_lea.vmem %s652_s8, 64  ;;  %p654_p8 = scmp.lt.s32.totalorder %s183_s26, %s652_s8 }
  0x44   : > { %p649_p1 = pnand %p647_p9, %p603_p3  ;;  %p655_p11 = scmp.lt.s32.totalorder %s653_s16, %s646_s25 }
  0x46   : > { %p650_p6 = pneg %p649_p1  ;;  %p656_p2 = por %p655_p11, %p654_p8 }
  0x48   : > { %p657_p5 = pnand %p656_p2, %p650_p6 }
  0x4a   : > { %660 = shalt.err (!%p657_p5)
}
  0x4b   : > { %541 = dma.hbm_to_vmem [thread:$0]  (!%p850_p0), %s895_s19, 32, %s183_s26, %s170_s30  }
  0x4c   : > { %p1039_p13 = scmp.ne.s32.totalorder %s1038_s15, 0 }
  0x4d   : > { %s920_s18 = sand.u32 (!%p1039_p13), 1, %s731_s10   ;;  %p1040_p3 = scmp.ne.s32.totalorder (!%p1039_p13), %s1033_s21, 0 }
  0x4e   : > { %191 = sbr.rel (%p1039_p13) target bundleno = 132 (0x84), region = 28  ;;  %s500_s20 = sshll.u32 (!%p1039_p13), %s920_s18, 3 }
  0x4f   : > { %s194_s4 = scalar_lea.sflag (!%p1039_p13), [#allocation3], %s920_s18  ;;  %s197_s6 = scalar_lea.vmem (!%p1039_p13), [#allocation2], %s500_s20 }
  0x55   : > { %714 = dma.done.wait (%p1040_p3), %s194_s4, 128  }
  0x56   : > { %716 = vsyncadd (%p1040_p3), %s194_s4, 4294967168  ;;  %s501_s5 = sshll.u32 %s920_s18, 1  ;;  %s203_s15 = scalar_lea.sflag [#allocation6], %s920_s18 }
  0x57   : > { %s206_s19 = scalar_lea.vmem [#allocation5], %s501_s5 }
  0x58   : > { %718 = dma.done.wait (%p1040_p3), %s203_s15, 32  }
  0x59   : > { %720 = vsyncadd (%p1040_p3), %s203_s15, 4294967264  ;;  %s502_s26 = sshll.u32 %s920_s18, 6  ;;  %v753_v0 = vmov 0.0   ;;  %v246_v1 = vld [vmem:[%s206_s19] sm:$0x3]  ;;  %vm254_vm0 = vcmask 1041408  }
  0x5a   : > { %s935_s30 = scalar_lea.vmem [#allocation7], %s502_s26  ;;  %v248_v2 = vld [vmem:[%s197_s6] sm:$0x3]  ;;  %v505_v3 = vld [vmem:[%s197_s6 + $0x2] sm:$0x3]  ;;  %v527_v4 = vtrunc.f32 %v246_v1  ;;  %s526_s21 = sshll.u32 %s739_s12, 10 }
  0x5b   : > { %238 = vst [vmem:[%s935_s30] sm:$0xff] %v753_v0  ;;  %239 = vst [vmem:[%s935_s30 + $0x8] sm:$0xff] %v753_v0  ;;  %v510_v5 = vld [vmem:[%s197_s6 + $0x4] sm:$0x3]  ;;  %v515_v6 = vld [vmem:[%s197_s6 + $0x6] sm:$0x3]  ;;  %v251_v7 = vadd.f32 1.0, %v248_v2  ;;  %s972_s29 = scalar_lea.hbm %s1029_s2, %s526_s21 }
  0x5c   : > { %240 = vst [vmem:[%s935_s30 + $0x10] sm:$0xff] %v753_v0  ;;  %241 = vst [vmem:[%s935_s30 + $0x18] sm:$0xff] %v753_v0  ;;  %v279_v8 = vadd.f32 1.0, %v505_v3  ;;  %v528_v9 = vcvt.f32.s32 %v527_v4  ;;  %v307_v10 = vadd.f32 1.0, %v510_v5  ;;  %v335_v11 = vadd.f32 1.0, %v515_v6  ;;  %s375_s27 = sshll.u32 %s935_s30, 4  ;;  %s974_s27 = int_to_ptr.vmem [resolvable:$true] %s375_s27 }
  0x5d   : > { %242 = vst [vmem:[%s935_s30 + $0x20] sm:$0xff] %v753_v0  ;;  %243 = vst [vmem:[%s935_s30 + $0x28] sm:$0xff] %v753_v0  ;;  %s360_s3 = scalar_lea.sflag [#allocation4], %s920_s18  ;;  %s661_s25 = scalar_lea.vmem %s974_s27, 1024 }
  0x5e   : > { %244 = vst [vmem:[%s935_s30 + $0x30] sm:$0xff] %v753_v0  ;;  %245 = vst [vmem:[%s935_s30 + $0x38] sm:$0xff] %v753_v0  ;;  %vm249_vm1 = vcmp.eq.s32.totalorder %v528_v9, 0  ;;  %vm277_vm2 = vcmp.eq.s32.totalorder %v528_v9, 1  ;;  %vm305_vm3 = vcmp.eq.s32.totalorder %v528_v9, 2  ;;  %vm333_vm4 = vcmp.eq.s32.totalorder %v528_v9, 3  ;;  %p662_p8 = scmp.ne.s32.totalorder %s974_s27, %s661_s25 }
  0x5f   : > { %v250_v12 = vsel %vm249_vm1, %v248_v2, 0.0  ;;  %v252_v13 = vsel %vm249_vm1, %v251_v7, %v248_v2  ;;  %v278_v14 = vsel %vm277_vm2, %v505_v3, 0.0  ;;  %v280_v15 = vsel %vm277_vm2, %v279_v8, %v505_v3  ;;  %p1041_p0 = scmp.ne.s32.totalorder %s1034_s22, 0  ;;  %s754_s7 = smov [#allocation7]  }
  0x60   : > { %v255_v16 = vsel %vm254_vm0, %v250_v12, 0.0  ;;  %v266_v17 = vsel %vm254_vm0, %v252_v13, 0.0  ;;  %v283_v18 = vsel %vm254_vm0, %v278_v14, 0.0  ;;  %v294_v19 = vsel %vm254_vm0, %v280_v15, 0.0  ;;  %s665_s8 = sshll.u32 %s754_s7, 4  ;;  %s666_s8 = int_to_ptr.vmem [resolvable:$false] %s665_s8 }
  0x61   : > { %v256_v20 = vrot.slane %v255_v16, 4  ;;  %v267_v21 = vrot.slane %v266_v17, 4  ;;  %v284_v22 = vrot.slane %v283_v18, 4  ;;  %v295_v23 = vrot.slane %v294_v19, 4  ;;  %p663_p11 = pnand %p662_p8, %p1041_p0  ;;  %s667_s16 = scalar_lea.vmem %s666_s8, 2048 }
  0x62   : > { %v306_v24 = vsel %vm305_vm3, %v510_v5, 0.0  ;;  %v308_v25 = vsel %vm305_vm3, %v307_v10, %v510_v5  ;;  %v334_v26 = vsel %vm333_vm4, %v515_v6, 0.0  ;;  %v336_v27 = vsel %vm333_vm4, %v335_v11, %v515_v6  ;;  %v253_v48 = vld [vmem:[%s935_s30] sm:$0x1]  ;;  %v506_v56 = vld [vmem:[%s935_s30 + $0x8] sm:$0x1]  ;;  %p668_p7 = scmp.lt.s32.totalorder %s974_s27, %s666_s8  ;;  %p669_p10 = scmp.lt.s32.totalorder %s667_s16, %s661_s25 }
  0x63   : > { %v257_v28 = vadd.f32 %v256_v20, %v255_v16  ;;  %v268_v29 = vadd.f32 %v267_v21, %v266_v17  ;;  %v285_v30 = vadd.f32 %v284_v22, %v283_v18  ;;  %v296_v31 = vadd.f32 %v295_v23, %v294_v19  ;;  %v511_v12 = vld [vmem:[%s935_s30 + $0x10] sm:$0x1]  ;;  %v516_v18 = vld [vmem:[%s935_s30 + $0x18] sm:$0x1]  ;;  %p664_p4 = pneg %p663_p11 }
  0x64   : > { %v311_v32 = vsel %vm254_vm0, %v306_v24, 0.0  ;;  %v322_v33 = vsel %vm254_vm0, %v308_v25, 0.0  ;;  %v339_v34 = vsel %vm254_vm0, %v334_v26, 0.0  ;;  %v350_v35 = vsel %vm254_vm0, %v336_v27, 0.0  ;;  %v503_v49 = vld [vmem:[%s935_s30 + $0x20] sm:$0x1]  ;;  %p670_p12 = por %p669_p10, %p668_p7 }
  0x65   : > { %v258_v36 = vrot.slane %v257_v28, 2  ;;  %v269_v37 = vrot.slane %v268_v29, 2  ;;  %v286_v38 = vrot.slane %v285_v30, 2  ;;  %v297_v39 = vrot.slane %v296_v31, 2  ;;  %v508_v59 = vld [vmem:[%s935_s30 + $0x28] sm:$0x1] }
  0x66   : > { %v312_v40 = vrot.slane %v311_v32, 4  ;;  %v323_v41 = vrot.slane %v322_v33, 4  ;;  %v340_v42 = vrot.slane %v339_v34, 4  ;;  %v351_v43 = vrot.slane %v350_v35, 4  ;;  %v513_v17 = vld [vmem:[%s935_s30 + $0x30] sm:$0x1]  ;;  %p671_p9 = pnand %p670_p12, %p664_p4 }
  0x67   : > { %v259_v44 = vadd.f32 %v258_v36, %v257_v28  ;;  %v270_v45 = vadd.f32 %v269_v37, %v268_v29  ;;  %v287_v46 = vadd.f32 %v286_v38, %v285_v30  ;;  %v298_v47 = vadd.f32 %v297_v39, %v296_v31  ;;  %v518_v19 = vld [vmem:[%s935_s30 + $0x38] sm:$0x1] }
  0x68   : > { %v313_v50 = vadd.f32 %v312_v40, %v311_v32  ;;  %v324_v51 = vadd.f32 %v323_v41, %v322_v33  ;;  %v341_v52 = vadd.f32 %v340_v42, %v339_v34  ;;  %v352_v53 = vadd.f32 %v351_v43, %v350_v35 }
  0x69   : > { %v260_v54 = vrot.slane %v259_v44, 1  ;;  %v271_v55 = vrot.slane %v270_v45, 1  ;;  %v288_v57 = vrot.slane %v287_v46, 1  ;;  %v299_v58 = vrot.slane %v298_v47, 1 }
  0x6a   : > { %v314_v60 = vrot.slane %v313_v50, 2  ;;  %v325_v61 = vrot.slane %v324_v51, 2  ;;  %v342_v62 = vrot.slane %v341_v52, 2  ;;  %v353_v63 = vrot.slane %v352_v53, 2 }
  0x6b   : > { %v261_v0 = vadd.f32 %v260_v54, %v259_v44  ;;  %v272_v1 = vadd.f32 %v271_v55, %v270_v45  ;;  %v289_v2 = vadd.f32 %v288_v57, %v287_v46  ;;  %v300_v3 = vadd.f32 %v299_v58, %v298_v47 }
  0x6c   : > { %v315_v4 = vadd.f32 %v314_v60, %v313_v50  ;;  %v326_v5 = vadd.f32 %v325_v61, %v324_v51  ;;  %v343_v6 = vadd.f32 %v342_v62, %v341_v52  ;;  %v354_v7 = vadd.f32 %v353_v63, %v352_v53 }
  0x6d   : > { %v262_v8 = vadd.f32 %v261_v0, %v253_v48  ;;  %v273_v9 = vadd.f32 %v503_v49, %v272_v1  ;;  %v290_v10 = vadd.f32 %v506_v56, %v289_v2  ;;  %v301_v11 = vadd.f32 %v508_v59, %v300_v3 }
  0x6e   : > { %v316_v13 = vrot.slane %v315_v4, 1  ;;  %v327_v14 = vrot.slane %v326_v5, 1  ;;  %v344_v15 = vrot.slane %v343_v6, 1  ;;  %v355_v16 = vrot.slane %v354_v7, 1 }
  0x6f   : > { %263 = vst [vmem:[%s935_s30] sm:$0x1] %v262_v8  ;;  %504 = vst [vmem:[%s935_s30 + $0x20] sm:$0x1] %v273_v9 }
  0x70   : > { %507 = vst [vmem:[%s935_s30 + $0x8] sm:$0x1] %v290_v10  ;;  %509 = vst [vmem:[%s935_s30 + $0x28] sm:$0x1] %v301_v11  ;;  %v317_v20 = vadd.f32 %v316_v13, %v315_v4  ;;  %v328_v21 = vadd.f32 %v327_v14, %v326_v5  ;;  %v345_v22 = vadd.f32 %v344_v15, %v343_v6 }
  0x71   : > { %v356_v23 = vadd.f32 %v355_v16, %v354_v7 }
  0x72   : > { %v318_v24 = vadd.f32 %v511_v12, %v317_v20  ;;  %v329_v25 = vadd.f32 %v513_v17, %v328_v21  ;;  %v346_v26 = vadd.f32 %v516_v18, %v345_v22 }
  0x73   : > { %v357_v27 = vadd.f32 %v518_v19, %v356_v23 }
  0x74   : > { %512 = vst [vmem:[%s935_s30 + $0x10] sm:$0x1] %v318_v24  ;;  %514 = vst [vmem:[%s935_s30 + $0x30] sm:$0x1] %v329_v25 }
  0x75   : > { %517 = vst [vmem:[%s935_s30 + $0x18] sm:$0x1] %v346_v26  ;;  %519 = vst [vmem:[%s935_s30 + $0x38] sm:$0x1] %v357_v27 }
  0x76   : > { %674 = shalt.err (!%p671_p9)
}
  0x77   : > { %s675_s20 = scalar_lea.hbm %s972_s29, 1024  ;;  %s679_s5 = scalar_lea.hbm %s1029_s2, 2048 }
  0x78   : > { %p676_p1 = scmp.ne.s32.totalorder %s972_s29, %s675_s20  ;;  %p680_p5 = scmp.lt.u32.totalorder %s972_s29, %s1029_s2 }
  0x79   : > { %p681_p13 = scmp.lt.u32.totalorder %s679_s5, %s675_s20  ;;  %p683_p8 = scmp.lt.u32.totalorder %s675_s20, %s972_s29 }
  0x7a   : > { %p677_p6 = pnand %p676_p1, %p1041_p0 }
  0x7b   : > { %p682_p3 = por %p681_p13, %p680_p5 }
  0x7c   : > { %p678_p2 = pneg %p677_p6 }
  0x7d   : > { %p684_p11 = por %p683_p8, %p682_p3 }
  0x7f   : > { %p685_p4 = pnand %p684_p11, %p678_p2 }
  0x81   : > { %688 = shalt.err (!%p685_p4)
}
  0x82   : > { %s755_s26 = smov 128   ;;  %s756_s30 = smov 8  }
  0x83   : > { %533 = dma.vmem_to_hbm [thread:$0]  (%p1041_p0), %s974_s27, 1024, %s972_s29, %s360_s3, %s755_s26, %s755_s26, %s756_s30  }
  0x84 PF: > { %s390_s21 = sand.u32 1, %s727_s9   ;;  %p1042_p7 = scmp.ne.s32.totalorder %s1035_s24, 0 }
  0x85   : > { %p1043_p10 = scmp.ge.s32.totalorder %s747_s14, 2  ;;  %s391_s12 = scalar_lea.sflag [#allocation4], %s390_s21 }
  0x87   : > { %p543_p12 = pnand %p1043_p10, %p1042_p7 }
  0x89   : > { %722 = dma.done.wait (!%p543_p12), %s391_s12, 1024  }
  0x8a   : > { %724 = vsyncadd (!%p543_p12), %s391_s12, 4294966272  ;;  %s21_s14 = sadd.s32 1, %s747_s14   ;;  %s1044_s9 = smov %s731_s10 }
  0x8b   : > { %p18_p9 = scmp.ge.s32.totalorder %s21_s14, 4   ;;  %s1045_s10 = smov %s735_s11 }
  0x8c   : > { %s1046_s11 = smov %s828_s23  ;;  %s1047_s12 = smov %s743_s13 }
  0x8d   : > { %s1048_s13 = smov %s1050_s17  ;;  %20 = sbr.rel (!%p18_p9) target bundleno = 8 (0x8), region = 100 }
  0x94   :  { %396 = vsyncpa [#allocation3], 1 }
  0x95   :  { %398 = vsyncpa [#allocation3 + $0x1], 1 }
  0x96   :  { %399 = vsyncpa [#allocation6], 1 }
  0x97   :  { %401 = vsyncpa [#allocation6 + $0x1], 1 }
  0x98   :  { %402 = vsyncpa [#allocation4], 1 }
  0x99   :  { %404 = vsyncpa [#allocation4 + $0x1], 1 }

</bundles_post_ra>
